<compile_context>
chip_gen: v6e
topology: v6e:2x2x1
jax: 0.10.0
libtpu: 0.0.40
codegen_flags: <defaults>
</compile_context>

<pallas_src>
import jax
import jax.numpy as jnp
from jax.experimental import pallas as pl
from jax.experimental.pallas import tpu as pltpu


_LANE = 128      # lane width (last dim)
_SUBLANE = 8     # sublane width (second-to-last dim, f32)


def _round_up(x, m):
    return ((x + m - 1) // m) * m


def _graph_nudger_kernel(eta_ref, grad_ref, sim_ref, wt_ref, out_ref):
    """eta_ref: SMEM (1,1) f32; grad_ref: [TB,F] f32; sim_ref: [TB,S] bf16;
    wt_ref: [S,TD] bf16; out_ref: [TB,TD]."""
    g = grad_ref[...]                                           # [TB, F] f32
    # eta folded into the per-row L2 norm (cheap XLU reduce + EUP sqrt).
    scale = eta_ref[0, 0] * jnp.sqrt(
        jnp.sum(g * g, axis=1, keepdims=True))                  # [TB, 1]
    # Similarity-weighted edge accumulation on the MXU: bf16 operands,
    # f32 accumulation.
    acc = jnp.dot(sim_ref[...], wt_ref[...],
                  preferred_element_type=jnp.float32)           # [TB, TD] f32
    out_ref[...] = (acc * scale).astype(out_ref.dtype)


def graph_nudger(grad_output_batch, sim, w_t, eta=0.01, *,
                 tile_b=256, tile_d=512, mxu_dtype=jnp.bfloat16,
                 out_dtype=jnp.float32, xla_fallback_threshold=None):
    """grad_output_batch: [B, F], sim: [B, S], w_t: [S, D] -> nudges [B, D].

    xla_fallback_threshold: if set and B*S*D is below it, use the fused 3-op
    XLA expression instead of launching a kernel (launch overhead dominates
    at tiny sizes). Disabled by default so the Pallas path is exercised.
    """
    B, F = grad_output_batch.shape
    S, D = w_t.shape
    assert sim.shape == (B, S)

    if xla_fallback_threshold is not None and B * S * D < xla_fallback_threshold:
        gnorm = jnp.linalg.norm(grad_output_batch.astype(jnp.float32),
                                axis=1, keepdims=True)
        return (eta * (sim.astype(jnp.float32) @ w_t.astype(jnp.float32))
                * gnorm).astype(out_dtype)

    grad_f32 = grad_output_batch.astype(jnp.float32)
    sim_lo = sim.astype(mxu_dtype)
    wt_lo = w_t.astype(mxu_dtype)

    # --- batch tiling: never shrink toward 8-row tiles.  Either the whole
    # batch is one tall full-dim block (no padding, always layout-legal), or
    # B is padded UP to a multiple of the tile so MXU tiles stay tall.
    tile_b = _round_up(max(tile_b, _SUBLANE), _SUBLANE)
    if B <= tile_b:
        TB, Bp = B, B
    else:
        TB = tile_b
        Bp = _round_up(B, TB)
    if Bp != B:
        grad_f32 = jnp.zeros((Bp, F), jnp.float32).at[:B].set(grad_f32)
        sim_lo = jnp.zeros((Bp, S), mxu_dtype).at[:B].set(sim_lo)

    # --- disease (lane) axis: pad to a 128 multiple for a lane-dense output
    # (unmasked vst) and tile it so W^T is never fully resident in VMEM.
    Dp = _round_up(D, _LANE)
    TD = min(_round_up(tile_d, _LANE), Dp)
    while Dp % TD != 0:        # terminates at 128 (Dp % 128 == 0): still a
        TD -= _LANE            # full-lane MXU tile, unlike 8-row batch tiles.
    if Dp != D:
        wt_lo = jnp.zeros((S, Dp), mxu_dtype).at[:, :D].set(wt_lo)

    eta_arr = jnp.full((1, 1), eta, dtype=jnp.float32)

    grid = (Bp // TB, Dp // TD)

    # Scoped-VMEM budget from the actual (double-buffered) tile footprint.
    elem = jnp.dtype(mxu_dtype).itemsize
    footprint = (TB * F * 4          # grad tile (f32)
                 + TB * S * elem     # sim tile
                 + S * TD * elem     # W^T tile
                 + TB * TD * 4)      # out tile (accumulated in f32)
    vmem_limit = int(min(max(3 * footprint, 16 * 2**20), 96 * 2**20))

    cost = pl.CostEstimate(
        flops=2 * Bp * S * Dp + 2 * Bp * F,
        transcendentals=Bp * grid[1],
        bytes_accessed=(4 * Bp * F + elem * (Bp * S + S * Dp)
                        + jnp.dtype(out_dtype).itemsize * Bp * Dp),
    )

    out_p = pl.pallas_call(
        _graph_nudger_kernel,
        out_shape=jax.ShapeDtypeStruct((Bp, Dp), out_dtype),
        grid_spec=pltpu.PrefetchScalarGridSpec(
            num_scalar_prefetch=0,
            grid=grid,
            in_specs=[
                # eta: (1,1) scalar in SMEM -> no recompile when it changes.
                pl.BlockSpec(memory_space=pltpu.MemorySpace.SMEM),
                # grad: F at its natural size (full-dim block is legal);
                # block index is constant across the D axis, so the pipeline
                # does not re-DMA it per D tile.
                pl.BlockSpec((TB, F), lambda i, j: (i, 0)),
                # sim: S at its natural size, bf16 tile.
                pl.BlockSpec((TB, S), lambda i, j: (i, 0)),
                # W^T: bf16, tiled along D -> bounded VMEM even for big graphs.
                pl.BlockSpec((S, TD), lambda i, j: (0, j)),
            ],
            out_specs=pl.BlockSpec((TB, TD), lambda i, j: (i, j)),
        ),
        compiler_params=pltpu.CompilerParams(
            dimension_semantics=("parallel", "parallel"),
            vmem_limit_bytes=vmem_limit),
        cost_estimate=cost,
    )(eta_arr, grad_f32, sim_lo, wt_lo)

    if Bp != B or Dp != D:
        out_p = out_p[:B, :D]
    return out_p


# ---------------------------------------------------------------------------
# Glue: turn the graph dict + signs_found dict into dense operands.
# TODO(synk): graph / signs_found dict traversal stays host-side by design
# (no Pallas equivalent for Python dict walking).
# ---------------------------------------------------------------------------
def build_weight_matrix(graph, num_diseases, num_signs):
    import numpy as np
    W = np.zeros((num_diseases, num_signs), dtype=np.float32)
    for edge in graph["links"]:
        if edge["relation"] == "finding":
            d = int(edge["source"])
            s = int(edge["target"])
            w = float(edge.get("weight", 1.0))
            W[d, s] += w
    return jnp.asarray(W)


def build_similarity_matrix(signs_found, batch, num_signs):
    import numpy as np
    S = np.zeros((batch, num_signs), dtype=np.float32)
    for i in range(batch):
        for s_dict in signs_found[i]:
            s_id = int(s_dict["id"])
            sim = float(s_dict.get("similarity", 0.0))
            S[i, s_id] += sim
    return jnp.asarray(S)


def reference_nudges(grad_output_batch, sim, w_t, eta, mxu_dtype=jnp.bfloat16):
    # Reference with the same bf16 operand rounding the MXU path uses
    # (f32 accumulation), so the comparison is tight and meaningful.
    sim_r = sim.astype(mxu_dtype).astype(jnp.float32)
    wt_r = w_t.astype(mxu_dtype).astype(jnp.float32)
    gnorm = jnp.linalg.norm(grad_output_batch.astype(jnp.float32),
                            axis=1, keepdims=True)
    return eta * (sim_r @ wt_r) * gnorm


if __name__ == "__main__":
    key = jax.random.PRNGKey(0)
    B = 2            # batch
    F_DIM = 32       # classifier gradient feature dim
    NUM_DISEASES = 14
    NUM_SIGNS = 8
    ETA = 0.01

    k1, _ = jax.random.split(key)
    grad_output_batch = jax.random.normal(k1, (B, F_DIM), dtype=jnp.float32)

    # Deterministic synthetic knowledge graph: 'finding' edges disease -> sign.
    graph = {
        "links": [
            {"source": d, "target": (d + j) % NUM_SIGNS,
             "relation": "finding", "weight": 0.5 + 0.1 * ((d + j) % 5)}
            for d in range(NUM_DISEASES) for j in range(2)
        ]
        + [{"source": 0, "target": 3, "relation": "causes", "weight": 9.0}]
    }

    # Deterministic per-sample signs found (id + cosine-similarity in [0,1]).
    signs_found = {
        0: [{"id": 0, "similarity": 0.9},
            {"id": 3, "similarity": 0.4},
            {"id": 5, "similarity": 0.7}],
        1: [{"id": 1, "similarity": 0.8},
            {"id": 2, "similarity": 0.6}],
    }

    W = build_weight_matrix(graph, NUM_DISEASES, NUM_SIGNS)   # [D, S]
    sim = build_similarity_matrix(signs_found, B, NUM_SIGNS)  # [B, S]
    w_t = W.T                                                  # [S, D]

    out = graph_nudger(grad_output_batch, sim, w_t, eta=ETA)
    out = jax.block_until_ready(out)

    ref = reference_nudges(grad_output_batch, sim, w_t, ETA)
    assert out.shape == (B, NUM_DISEASES)
    assert jnp.allclose(out, ref, atol=1e-5, rtol=1e-3)

    print("KERNEL_OK")
</pallas_src>

<mosaic_0001>
module attributes {stable_mosaic.version = 11 : i64} {
  func.func @_graph_nudger_kernel(%arg0: i32, %arg1: i32, %arg2: memref<1x1xf32, #tpu.memory_space<smem>>, %arg3: memref<2x32xf32, #tpu.memory_space<vmem>>, %arg4: memref<2x8xbf16, #tpu.memory_space<vmem>>, %arg5: memref<8x128xbf16, #tpu.memory_space<vmem>>, %arg6: memref<2x128xf32, #tpu.memory_space<vmem>>) attributes {dimension_semantics = [#tpu.dimension_semantics<parallel>, #tpu.dimension_semantics<parallel>], iteration_bounds = array<i64: 1, 1>, scalar_prefetch = 0 : i64, scratch_operands = 0 : i64, tpu.core_type = #tpu.core_type<tc>, window_params = [{transform_indices = @transform_0, window_bounds = array<i64: 1, 1>}, {transform_indices = @transform_1, window_bounds = array<i64: 2, 32>}, {transform_indices = @transform_2, window_bounds = array<i64: 2, 8>}, {transform_indices = @transform_3, window_bounds = array<i64: 8, 128>}, {transform_indices = @transform_4, window_bounds = array<i64: 2, 128>}]} {
    %c0 = arith.constant 0 : index
    %c0_0 = arith.constant 0 : index
    %0 = vector.load %arg3[%c0, %c0_0] : memref<2x32xf32, #tpu.memory_space<vmem>>, vector<2x32xf32>
    %c0_1 = arith.constant 0 : index
    %c0_2 = arith.constant 0 : index
    %1 = memref.load %arg2[%c0_1, %c0_2] : memref<1x1xf32, #tpu.memory_space<smem>>
    %2 = arith.mulf %0, %0 : vector<2x32xf32>
    %cst = arith.constant dense<0.000000e+00> : vector<2xf32>
    %3 = vector.multi_reduction <add>, %2, %cst [1] : vector<2x32xf32> to vector<2xf32>
    %4 = vector.shape_cast %3 : vector<2xf32> to vector<2x1xf32>
    %5 = math.sqrt %4 : vector<2x1xf32>
    %6 = vector.broadcast %1 : f32 to vector<2x1xf32>
    %7 = arith.mulf %6, %5 : vector<2x1xf32>
    %c0_3 = arith.constant 0 : index
    %c0_4 = arith.constant 0 : index
    %8 = vector.load %arg4[%c0_3, %c0_4] : memref<2x8xbf16, #tpu.memory_space<vmem>>, vector<2x8xbf16>
    %c0_5 = arith.constant 0 : index
    %c0_6 = arith.constant 0 : index
    %9 = vector.load %arg5[%c0_5, %c0_6] : memref<8x128xbf16, #tpu.memory_space<vmem>>, vector<8x128xbf16>
    %cst_7 = arith.constant dense<0.000000e+00> : vector<2x128xf32>
    %10 = tpu.matmul %8, %9, %cst_7 {dimension_numbers = #tpu.dot_dimension_numbers<[1], [0], [0], [1], [0, 0, 1, 1], [], []>} : vector<2x8xbf16>, vector<8x128xbf16>, vector<2x128xf32> -> vector<2x128xf32>
    %11 = vector.broadcast %7 : vector<2x1xf32> to vector<2x128xf32>
    %12 = arith.mulf %10, %11 : vector<2x128xf32>
    %c0_8 = arith.constant 0 : index
    %c0_9 = arith.constant 0 : index
    %13 = vector.load %arg6[%c0_8, %c0_9] : memref<2x128xf32, #tpu.memory_space<vmem>>, vector<2x128xf32>
    tpu.vector_store %arg6[%c0_8, %c0_9], %12 {strides = array<i32>} : memref<2x128xf32, #tpu.memory_space<vmem>>, vector<2x128xf32>,
    return
  }
  func.func @transform_0(%arg0: i32, %arg1: i32) -> (i32, i32) {
    %c0_i32 = arith.constant 0 : i32
    %c0_i32_0 = arith.constant 0 : i32
    %c0_i32_1 = arith.constant 0 : i32
    return %c0_i32, %c0_i32_0 : i32, i32
  }
  func.func @transform_1(%arg0: i32, %arg1: i32) -> (i32, i32) {
    %c0_i32 = arith.constant 0 : i32
    %c0_i32_0 = arith.constant 0 : i32
    return %arg0, %c0_i32 : i32, i32
  }
  func.func @transform_2(%arg0: i32, %arg1: i32) -> (i32, i32) {
    %c0_i32 = arith.constant 0 : i32
    %c0_i32_0 = arith.constant 0 : i32
    return %arg0, %c0_i32 : i32, i32
  }
  func.func @transform_3(%arg0: i32, %arg1: i32) -> (i32, i32) {
    %c0_i32 = arith.constant 0 : i32
    %c0_i32_0 = arith.constant 0 : i32
    return %c0_i32, %arg1 : i32, i32
  }
  func.func @transform_4(%arg0: i32, %arg1: i32) -> (i32, i32) {
    %c0_i32 = arith.constant 0 : i32
    return %arg0, %arg1 : i32, i32
  }
}

</mosaic_0001>

<bundles_post_ra>
// kernel: tpu_custom_call.1
= control target key start
LH: loop header
LB: loop body
LE: loop exit
PB: predicated region body
PF: predicated region fallthrough
CT: control target
= control target key end

     0   :  { %10 = vsyncpa [#allocation4], 0  ;;  %s218_s0 = inlined_call_operand.<no memory space> [shape: f32[1,1], index: 0, kind: input, shape index: {}]   ;;  %s219_s1 = inlined_call_operand.hbm [shape: f32[2,32], index: 1, kind: input, shape index: {}]   ;;  %s220_s2 = inlined_call_operand.vmem [shape: bf16[2,8], index: 2, kind: input, shape index: {}]   ;;  %s221_s3 = inlined_call_operand.vmem [shape: bf16[8,128], index: 3, kind: input, shape index: {}]   ;;  %s222_s4 = inlined_call_operand.hbm [shape: f32[2,128], index: 4, kind: output, shape index: {}]  }
   0x1   :  { %11 = vsyncpa [#allocation5], 0  ;;  %s174_s15 = smov [#allocation3]  }
   0x2   :  { %s20_s16 = sshll.u32 %s174_s15, 4  ;;  %s21_s16 = int_to_ptr.vmem [resolvable:$true] %s20_s16 }
   0x3   :  { %s138_s17 = scalar_lea.vmem %s21_s16, 32  ;;  %p143_p1 = scmp.lt.s32.totalorder %s21_s16, %s21_s16 }
   0x4   :  { %p139_p0 = scmp.ne.s32.totalorder %s21_s16, %s138_s17  ;;  %p144_p2 = scmp.lt.s32.totalorder %s138_s17, %s138_s17 }
   0x6   :  { %p145_p3 = por %p144_p2, %p143_p1 }
   0x8   :  { %p146_p4 = pnand %p145_p3, %p139_p0 }
   0xa   :  { %149 = shalt.err (!%p146_p4)
}
   0xb   :  { %23 = dma.hbm_to_vmem [thread:$0]  %s219_s1, 32, %s21_s16, [#allocation4]  }
   0xc   :  { %170 = dma.done.wait [#allocation4], 32  }
   0xd   :  { %171 = vsyncadd [#allocation4], 4294967264  ;;  %v175_v0 = vmov 0.0   ;;  %vm176_vm0 = vmmov 0   ;;  %vm54_vm1 = vcmask 1043456   ;;  %vm35_vm2 = vcmask 254976  }
   0xe   :  { %118 = vmatprep.subr.bf16.mxu0 %v175_v0  ;;  %120 = vmatprep.mubr.msk.bf16.mxu0 %vm176_vm0, %v175_v0  ;;  %v49_v1 = vld [vmem:[%s221_s3] sm:$0xf]  ;;  %vm50_vm3 = vcmask 64512   ;;  %v46_v13 = vstv %s218_s0  ;;  %s177_s24 = smov [#allocation6]  }
   0xf   :  { %v32_v2 = vld [vmem:[#allocation3] sm:$0x3]  ;;  %v56_v3 = vsel %vm54_vm1, %v49_v1, 0  ;;  %s106_s25 = sshll.u32 %s177_s24, 4  ;;  %s107_s25 = int_to_ptr.vmem [resolvable:$true] %s106_s25 }
  0x10   :  { %v34_v4 = vmul.f32 %v32_v2, %v32_v2  ;;  %119 = vmatpush3.bf16.msra.mxu0 %v56_v3  ;;  %v48_v5 = vld [vmem:[%s220_s2] sm:$0x1]  ;;  %s150_s2 = scalar_lea.vmem %s107_s25, 32  ;;  %p155_p6 = scmp.lt.s32.totalorder %s107_s25, %s107_s25 }
  0x11   :  { %p151_p5 = scmp.ne.s32.totalorder %s107_s25, %s150_s2  ;;  %p156_p7 = scmp.lt.s32.totalorder %s150_s2, %s150_s2 }
  0x12   :  { %v36_v6 = vsel %vm35_vm2, %v34_v4, 0.0 }
  0x13   :  { %37 = vadd.xlane.f32.xlu0 %v36_v6  ;;  %121 = vmatmul.mubr.msk.bf16.vlgmr.msra.gmra.mxu0 %vm50_vm3, %v48_v5  ;;  %p157_p8 = por %p156_p7, %p155_p6 }
  0x15   :  { %p158_p9 = pnand %p157_p8, %p151_p5 }
  0x9c   :  { %v38_v7 = vpop.xlane.xlu0 %37 }
  0x9d   :  { %128 = vrsqrt.f32 %v38_v7  ;;  %vm41_vm4 = vcmp.eq.f32.partialorder %v38_v7, inf  ;;  %v44_v10 = vand.u32 2147483648, %v38_v7  ;;  %vm43_vm5 = vcmp.eq.f32.partialorder %v38_v7, 0.0 }
  0xaa   :  { %v129_v8 = vpop.eup %128 }
  0xab   :  { %v40_v9 = vmul.f32 %v129_v8, %v38_v7 }
  0xad   :  { %v42_v11 = vsel %vm41_vm4, %v38_v7, %v40_v9 }
  0xae   :  { %v45_v12 = vsel %vm43_vm5, %v44_v10, %v42_v11 }
  0xaf   :  { %v47_v14 = vmul.f32 %v46_v13, %v45_v12 }
  0xd3   :  { %v92_v15 = vpop.f32.mrf.mxu0 }
  0xd4   :  { %v98_v16 = vmul.f32 %v92_v15, %v47_v14 }
  0xd5   :  { %v122_v17 = vpop.f32.mrf.mxu0 }
  0xd6   :  { %99 = vst [vmem:[#allocation6] sm:$0x3] %v98_v16 }
  0xd7   :  { %v95_v18 = vpop.f32.mrf.mxu0 }
  0xd8   :  { %161 = shalt.err (!%p158_p9)
}
  0xd9   :  { %109 = dma.vmem_to_hbm [thread:$0]  %s107_s25, 32, %s222_s4, [#allocation5]   ;;  %v123_v19 = vpop.f32.mrf.mxu0 }
  0xda   :  { %172 = dma.done.wait [#allocation5], 32  }
  0xdb   :  { %173 = vsyncadd [#allocation5], 4294967264 }
  0xdc   :  { %113 = vsyncpa [#allocation4], 1 }
  0xdd   :  { %114 = vsyncpa [#allocation5], 1 }

</bundles_post_ra>
